<compile_context>
chip_gen: v6e
topology: v6e:2x2x1
jax: 0.10.0
libtpu: 0.0.40
codegen_flags: <defaults>
</compile_context>

<pallas_src>
import functools

import jax
import jax.numpy as jnp
from jax.experimental import pallas as pl
from jax.experimental.pallas import tpu as pltpu

LANE = 128                      # vreg lane width
SUBLANE = 8                     # vreg sublane count (f32)
_VMEM_LIMIT = 32 * 1024 * 1024  # safe on v5e/v6e (128 MiB) and v7x (64 MiB physical)
_FUSED_VMEM_BUDGET = 24 * 1024 * 1024  # padded operands above this -> per-layer path


def _round_up(x, m):
    return (x + m - 1) // m * m


def _relu_flags(n_layers):
    # DenseNN: ReLU after every Linear except the last one.
    return tuple(i < n_layers - 1 for i in range(n_layers))


# ---------------- fused whole-network kernel ---------------------------------

def _fused_mlp_kernel(x_ref, *refs, n_layers, relu_flags):
    """Chained Linear(+ReLU) on one batch tile; activation stays resident in VMEM."""
    w_refs = refs[:n_layers]
    b_refs = refs[n_layers:2 * n_layers]
    o_ref = refs[2 * n_layers]

    h = x_ref[...].astype(jnp.float32)
    for i in range(n_layers):                       # unrolled: layer count is static
        w = w_refs[i][...]                          # (Kp, Np) bf16, zero padded
        b = b_refs[i][...]                          # (1, Np) f32, zero padded
        # bf16 MXU matmul with f32 accumulation; epilogue stays in f32.
        h = jnp.dot(h.astype(w.dtype), w, preferred_element_type=jnp.float32)
        h = h + b
        if relu_flags[i]:
            h = jnp.maximum(h, 0.0)
    o_ref[...] = h.astype(o_ref.dtype)


def fused_mlp_pallas(layers, relu_flags, x, *, tm=None):
    """Run the whole Linear(+ReLU) chain in one pallas_call.

    layers: list of (w:(K,N) f32, b:(N,) f32); relu_flags[i] -> ReLU after layer i.
    """
    n_layers = len(layers)
    m, k0 = x.shape
    dims = [k0] + [w.shape[1] for (w, _) in layers]
    pdims = [_round_up(d, LANE) for d in dims]       # lane-dense feature widths

    if tm is None:
        tm = min(_round_up(m, SUBLANE), 128)         # sublane-aligned batch tile
    m_pad = _round_up(m, tm)

    x_p = jnp.zeros((m_pad, pdims[0]), jnp.float32).at[:m, :k0].set(x)
    ws, bs = [], []
    for li, (w, b) in enumerate(layers):
        kin, kout = w.shape
        wp = jnp.zeros((pdims[li], pdims[li + 1]), jnp.bfloat16)
        wp = wp.at[:kin, :kout].set(w.astype(jnp.bfloat16))
        bp = jnp.zeros((1, pdims[li + 1]), jnp.float32).at[0, :kout].set(b)
        ws.append(wp)
        bs.append(bp)

    grid = (m_pad // tm,)
    in_specs = [pl.BlockSpec((tm, pdims[0]), lambda i: (i, 0))]
    for li in range(n_layers):                       # whole weight per grid step
        in_specs.append(pl.BlockSpec((pdims[li], pdims[li + 1]), lambda i: (0, 0)))
    for li in range(n_layers):                       # (1, Np) bias blocks
        in_specs.append(pl.BlockSpec((1, pdims[li + 1]), lambda i: (0, 0)))
    out_specs = pl.BlockSpec((tm, pdims[-1]), lambda i: (i, 0))

    flops = int(sum(2 * m_pad * pdims[li] * pdims[li + 1] for li in range(n_layers)))
    bytes_accessed = int(
        x_p.size * 4
        + sum(w.size * 2 for w in ws)
        + sum(b.size * 4 for b in bs)
        + m_pad * pdims[-1] * 4
    )

    out = pl.pallas_call(
        functools.partial(_fused_mlp_kernel, n_layers=n_layers,
                          relu_flags=tuple(relu_flags)),
        out_shape=jax.ShapeDtypeStruct((m_pad, pdims[-1]), jnp.float32),
        grid=grid,
        in_specs=in_specs,
        out_specs=out_specs,
        compiler_params=pltpu.CompilerParams(
            dimension_semantics=("parallel",),        # batch tiles -> both TCs on v7x
            vmem_limit_bytes=_VMEM_LIMIT,
        ),
        cost_estimate=pl.CostEstimate(
            flops=flops, transcendentals=0, bytes_accessed=bytes_accessed),
    )(x_p, *ws, *bs)

    return out[:m, :dims[-1]]


def _fused_footprint_bytes(layers, m):
    """Rough padded VMEM footprint (double-buffered inputs/outputs + live activation)."""
    dims = [layers[0][0].shape[0]] + [w.shape[1] for (w, _) in layers]
    pdims = [_round_up(d, LANE) for d in dims]
    tm = min(_round_up(m, SUBLANE), 128)
    w_bytes = sum(2 * pdims[i] * pdims[i + 1] for i in range(len(layers)))   # bf16
    b_bytes = sum(4 * pdims[i + 1] for i in range(len(layers)))
    io_bytes = 4 * tm * pdims[0] + 4 * tm * pdims[-1]
    act_bytes = 4 * tm * max(pdims)
    return 2 * (w_bytes + b_bytes + io_bytes) + 4 * act_bytes


# ---------------- per-layer fallback (very large layers only) ----------------

def _linear_kernel(x_ref, w_ref, b_ref, o_ref, *, apply_relu):
    y = jnp.dot(x_ref[...].astype(w_ref.dtype), w_ref[...],
                preferred_element_type=jnp.float32)
    y = y + b_ref[...]
    if apply_relu:
        y = jnp.maximum(y, 0.0)
    o_ref[...] = y.astype(o_ref.dtype)


def linear_pallas(x, w, b, apply_relu, *, tm=None):
    """Single fused Linear(+ReLU); lane/sublane padded, batch-tiled grid.
    # TODO(synk): add a K grid axis + f32 accumulator scratch for K >> VMEM-friendly sizes.
    """
    m, k = x.shape
    _, n = w.shape
    kp, np_ = _round_up(k, LANE), _round_up(n, LANE)
    if tm is None:
        tm = min(_round_up(m, SUBLANE), 128)
    m_pad = _round_up(m, tm)

    x_p = jnp.zeros((m_pad, kp), jnp.float32).at[:m, :k].set(x)
    w_p = jnp.zeros((kp, np_), jnp.bfloat16).at[:k, :n].set(w.astype(jnp.bfloat16))
    b_p = jnp.zeros((1, np_), jnp.float32).at[0, :n].set(b)

    out = pl.pallas_call(
        functools.partial(_linear_kernel, apply_relu=apply_relu),
        out_shape=jax.ShapeDtypeStruct((m_pad, np_), jnp.float32),
        grid=(m_pad // tm,),
        in_specs=[pl.BlockSpec((tm, kp), lambda i: (i, 0)),
                  pl.BlockSpec((kp, np_), lambda i: (0, 0)),
                  pl.BlockSpec((1, np_), lambda i: (0, 0))],
        out_specs=pl.BlockSpec((tm, np_), lambda i: (i, 0)),
        compiler_params=pltpu.CompilerParams(
            dimension_semantics=("parallel",), vmem_limit_bytes=_VMEM_LIMIT),
        cost_estimate=pl.CostEstimate(
            flops=int(2 * m_pad * kp * np_), transcendentals=0,
            bytes_accessed=int(x_p.size * 4 + w_p.size * 2 + b_p.size * 4
                               + m_pad * np_ * 4)),
    )(x_p, w_p, b_p)
    return out[:m, :n]


# ---------------- parameter construction (mirrors nn.Linear default init) ----

def _init_linear(key, in_features, out_features, dtype=jnp.float32):
    kw, kb = jax.random.split(key)
    bound = 1.0 / (in_features ** 0.5)
    # Stored as (in, out) == PyTorch weight.T
    w = jax.random.uniform(kw, (in_features, out_features), dtype, -bound, bound)
    b = jax.random.uniform(kb, (out_features,), dtype, -bound, bound)
    return w, b


def _init_dense_nn(key, insize, outsize, hsize):
    dims = [insize] + list(hsize) + [outsize]
    keys = jax.random.split(key, len(dims) - 1)
    return [_init_linear(keys[i], dims[i], dims[i + 1]) for i in range(len(dims) - 1)]


def init_deep_autoencoder(key, insize, outsize, hsize):
    ke, kd = jax.random.split(key)
    enc = _init_dense_nn(ke, insize, outsize, hsize)
    dec = _init_dense_nn(kd, outsize, insize, list(reversed(hsize)))
    return {"encoder": enc, "decoder": dec}


# ---------------- forward passes ---------------------------------------------

def deep_autoencoder_forward(params, x):
    enc, dec = params["encoder"], params["decoder"]
    layers = list(enc) + list(dec)
    relu_flags = _relu_flags(len(enc)) + _relu_flags(len(dec))

    if _fused_footprint_bytes(layers, x.shape[0]) <= _FUSED_VMEM_BUDGET:
        # Main path: whole autoencoder in one kernel, activations stay in VMEM.
        return fused_mlp_pallas(layers, relu_flags, x)

    # Fallback for very large layers: one fused Linear(+ReLU) kernel per layer.
    h = x
    for (w, b), flag in zip(layers, relu_flags):
        h = linear_pallas(h, w, b, apply_relu=flag)
    return h


# ---------------- pure-JAX reference (same bf16-matmul numerics) -------------

def _dense_chain_ref(layers, relu_flags, x):
    for (w, b), flag in zip(layers, relu_flags):
        y = jnp.dot(x.astype(jnp.bfloat16), w.astype(jnp.bfloat16),
                    preferred_element_type=jnp.float32)
        y = y + b
        x = jnp.maximum(y, 0.0) if flag else y
    return x


def _autoencoder_ref(params, x):
    enc, dec = params["encoder"], params["decoder"]
    z = _dense_chain_ref(enc, _relu_flags(len(enc)), x)
    return _dense_chain_ref(dec, _relu_flags(len(dec)), z)


if __name__ == "__main__":
    key = jax.random.PRNGKey(0)
    k_param, k_x = jax.random.split(key)

    batch, insize, outsize = 4, 32, 8
    hsize = [64, 16]

    params = init_deep_autoencoder(k_param, insize, outsize, hsize)
    x = jax.random.normal(k_x, (batch, insize), dtype=jnp.float32)

    fwd = jax.jit(deep_autoencoder_forward)
    out = jax.block_until_ready(fwd(params, x))

    ref = _autoencoder_ref(params, x)
    assert out.shape == (batch, insize), out.shape
    assert jnp.allclose(out, ref, atol=2e-3, rtol=2e-3), "mismatch vs reference"

    print("KERNEL_OK")
</pallas_src>

<mosaic_0001>
module attributes {stable_mosaic.version = 11 : i64} {
  func.func @_fused_mlp_kernel(%arg0: i32, %arg1: memref<8x128xf32, #tpu.memory_space<vmem>>, %arg2: memref<128x128xbf16, #tpu.memory_space<vmem>>, %arg3: memref<128x128xbf16, #tpu.memory_space<vmem>>, %arg4: memref<128x128xbf16, #tpu.memory_space<vmem>>, %arg5: memref<128x128xbf16, #tpu.memory_space<vmem>>, %arg6: memref<128x128xbf16, #tpu.memory_space<vmem>>, %arg7: memref<128x128xbf16, #tpu.memory_space<vmem>>, %arg8: memref<1x128xf32, #tpu.memory_space<vmem>>, %arg9: memref<1x128xf32, #tpu.memory_space<vmem>>, %arg10: memref<1x128xf32, #tpu.memory_space<vmem>>, %arg11: memref<1x128xf32, #tpu.memory_space<vmem>>, %arg12: memref<1x128xf32, #tpu.memory_space<vmem>>, %arg13: memref<1x128xf32, #tpu.memory_space<vmem>>, %arg14: memref<8x128xf32, #tpu.memory_space<vmem>>) attributes {dimension_semantics = [#tpu.dimension_semantics<parallel>], iteration_bounds = array<i64: 1>, scalar_prefetch = 0 : i64, scratch_operands = 0 : i64, tpu.core_type = #tpu.core_type<tc>, window_params = [{transform_indices = @transform_0, window_bounds = array<i64: 8, 128>}, {pipeline_mode = #tpu.pipeline_mode<synchronous>, transform_indices = @transform_1, window_bounds = array<i64: 128, 128>}, {pipeline_mode = #tpu.pipeline_mode<synchronous>, transform_indices = @transform_2, window_bounds = array<i64: 128, 128>}, {pipeline_mode = #tpu.pipeline_mode<synchronous>, transform_indices = @transform_3, window_bounds = array<i64: 128, 128>}, {pipeline_mode = #tpu.pipeline_mode<synchronous>, transform_indices = @transform_4, window_bounds = array<i64: 128, 128>}, {pipeline_mode = #tpu.pipeline_mode<synchronous>, transform_indices = @transform_5, window_bounds = array<i64: 128, 128>}, {pipeline_mode = #tpu.pipeline_mode<synchronous>, transform_indices = @transform_6, window_bounds = array<i64: 128, 128>}, {pipeline_mode = #tpu.pipeline_mode<synchronous>, transform_indices = @transform_7, window_bounds = array<i64: 1, 128>}, {pipeline_mode = #tpu.pipeline_mode<synchronous>, transform_indices = @transform_8, window_bounds = array<i64: 1, 128>}, {pipeline_mode = #tpu.pipeline_mode<synchronous>, transform_indices = @transform_9, window_bounds = array<i64: 1, 128>}, {pipeline_mode = #tpu.pipeline_mode<synchronous>, transform_indices = @transform_10, window_bounds = array<i64: 1, 128>}, {pipeline_mode = #tpu.pipeline_mode<synchronous>, transform_indices = @transform_11, window_bounds = array<i64: 1, 128>}, {pipeline_mode = #tpu.pipeline_mode<synchronous>, transform_indices = @transform_12, window_bounds = array<i64: 1, 128>}, {transform_indices = @transform_13, window_bounds = array<i64: 8, 128>}]} {
    %c0 = arith.constant 0 : index
    %c0_0 = arith.constant 0 : index
    %0 = vector.load %arg1[%c0, %c0_0] : memref<8x128xf32, #tpu.memory_space<vmem>>, vector<8x128xf32>
    %c0_1 = arith.constant 0 : index
    %c0_2 = arith.constant 0 : index
    %1 = vector.load %arg2[%c0_1, %c0_2] : memref<128x128xbf16, #tpu.memory_space<vmem>>, vector<128x128xbf16>
    %c0_3 = arith.constant 0 : index
    %c0_4 = arith.constant 0 : index
    %2 = vector.load %arg8[%c0_3, %c0_4] : memref<1x128xf32, #tpu.memory_space<vmem>>, vector<1x128xf32>
    %3 = arith.truncf %0 : vector<8x128xf32> to vector<8x128xbf16>
    %cst = arith.constant dense<0.000000e+00> : vector<8x128xf32>
    %4 = tpu.matmul %3, %1, %cst {dimension_numbers = #tpu.dot_dimension_numbers<[1], [0], [0], [1], [0, 0, 1, 1], [], []>} : vector<8x128xbf16>, vector<128x128xbf16>, vector<8x128xf32> -> vector<8x128xf32>
    %5 = vector.broadcast %2 : vector<1x128xf32> to vector<8x128xf32>
    %6 = arith.addf %4, %5 : vector<8x128xf32>
    %cst_5 = arith.constant 0.000000e+00 : f32
    %7 = vector.broadcast %cst_5 : f32 to vector<8x128xf32>
    %8 = arith.maximumf %6, %7 : vector<8x128xf32>
    %c0_6 = arith.constant 0 : index
    %c0_7 = arith.constant 0 : index
    %9 = vector.load %arg3[%c0_6, %c0_7] : memref<128x128xbf16, #tpu.memory_space<vmem>>, vector<128x128xbf16>
    %c0_8 = arith.constant 0 : index
    %c0_9 = arith.constant 0 : index
    %10 = vector.load %arg9[%c0_8, %c0_9] : memref<1x128xf32, #tpu.memory_space<vmem>>, vector<1x128xf32>
    %11 = arith.truncf %8 : vector<8x128xf32> to vector<8x128xbf16>
    %cst_10 = arith.constant dense<0.000000e+00> : vector<8x128xf32>
    %12 = tpu.matmul %11, %9, %cst_10 {dimension_numbers = #tpu.dot_dimension_numbers<[1], [0], [0], [1], [0, 0, 1, 1], [], []>} : vector<8x128xbf16>, vector<128x128xbf16>, vector<8x128xf32> -> vector<8x128xf32>
    %13 = vector.broadcast %10 : vector<1x128xf32> to vector<8x128xf32>
    %14 = arith.addf %12, %13 : vector<8x128xf32>
    %cst_11 = arith.constant 0.000000e+00 : f32
    %15 = vector.broadcast %cst_11 : f32 to vector<8x128xf32>
    %16 = arith.maximumf %14, %15 : vector<8x128xf32>
    %c0_12 = arith.constant 0 : index
    %c0_13 = arith.constant 0 : index
    %17 = vector.load %arg4[%c0_12, %c0_13] : memref<128x128xbf16, #tpu.memory_space<vmem>>, vector<128x128xbf16>
    %c0_14 = arith.constant 0 : index
    %c0_15 = arith.constant 0 : index
    %18 = vector.load %arg10[%c0_14, %c0_15] : memref<1x128xf32, #tpu.memory_space<vmem>>, vector<1x128xf32>
    %19 = arith.truncf %16 : vector<8x128xf32> to vector<8x128xbf16>
    %cst_16 = arith.constant dense<0.000000e+00> : vector<8x128xf32>
    %20 = tpu.matmul %19, %17, %cst_16 {dimension_numbers = #tpu.dot_dimension_numbers<[1], [0], [0], [1], [0, 0, 1, 1], [], []>} : vector<8x128xbf16>, vector<128x128xbf16>, vector<8x128xf32> -> vector<8x128xf32>
    %21 = vector.broadcast %18 : vector<1x128xf32> to vector<8x128xf32>
    %22 = arith.addf %20, %21 : vector<8x128xf32>
    %c0_17 = arith.constant 0 : index
    %c0_18 = arith.constant 0 : index
    %23 = vector.load %arg5[%c0_17, %c0_18] : memref<128x128xbf16, #tpu.memory_space<vmem>>, vector<128x128xbf16>
    %c0_19 = arith.constant 0 : index
    %c0_20 = arith.constant 0 : index
    %24 = vector.load %arg11[%c0_19, %c0_20] : memref<1x128xf32, #tpu.memory_space<vmem>>, vector<1x128xf32>
    %25 = arith.truncf %22 : vector<8x128xf32> to vector<8x128xbf16>
    %cst_21 = arith.constant dense<0.000000e+00> : vector<8x128xf32>
    %26 = tpu.matmul %25, %23, %cst_21 {dimension_numbers = #tpu.dot_dimension_numbers<[1], [0], [0], [1], [0, 0, 1, 1], [], []>} : vector<8x128xbf16>, vector<128x128xbf16>, vector<8x128xf32> -> vector<8x128xf32>
    %27 = vector.broadcast %24 : vector<1x128xf32> to vector<8x128xf32>
    %28 = arith.addf %26, %27 : vector<8x128xf32>
    %cst_22 = arith.constant 0.000000e+00 : f32
    %29 = vector.broadcast %cst_22 : f32 to vector<8x128xf32>
    %30 = arith.maximumf %28, %29 : vector<8x128xf32>
    %c0_23 = arith.constant 0 : index
    %c0_24 = arith.constant 0 : index
    %31 = vector.load %arg6[%c0_23, %c0_24] : memref<128x128xbf16, #tpu.memory_space<vmem>>, vector<128x128xbf16>
    %c0_25 = arith.constant 0 : index
    %c0_26 = arith.constant 0 : index
    %32 = vector.load %arg12[%c0_25, %c0_26] : memref<1x128xf32, #tpu.memory_space<vmem>>, vector<1x128xf32>
    %33 = arith.truncf %30 : vector<8x128xf32> to vector<8x128xbf16>
    %cst_27 = arith.constant dense<0.000000e+00> : vector<8x128xf32>
    %34 = tpu.matmul %33, %31, %cst_27 {dimension_numbers = #tpu.dot_dimension_numbers<[1], [0], [0], [1], [0, 0, 1, 1], [], []>} : vector<8x128xbf16>, vector<128x128xbf16>, vector<8x128xf32> -> vector<8x128xf32>
    %35 = vector.broadcast %32 : vector<1x128xf32> to vector<8x128xf32>
    %36 = arith.addf %34, %35 : vector<8x128xf32>
    %cst_28 = arith.constant 0.000000e+00 : f32
    %37 = vector.broadcast %cst_28 : f32 to vector<8x128xf32>
    %38 = arith.maximumf %36, %37 : vector<8x128xf32>
    %c0_29 = arith.constant 0 : index
    %c0_30 = arith.constant 0 : index
    %39 = vector.load %arg7[%c0_29, %c0_30] : memref<128x128xbf16, #tpu.memory_space<vmem>>, vector<128x128xbf16>
    %c0_31 = arith.constant 0 : index
    %c0_32 = arith.constant 0 : index
    %40 = vector.load %arg13[%c0_31, %c0_32] : memref<1x128xf32, #tpu.memory_space<vmem>>, vector<1x128xf32>
    %41 = arith.truncf %38 : vector<8x128xf32> to vector<8x128xbf16>
    %cst_33 = arith.constant dense<0.000000e+00> : vector<8x128xf32>
    %42 = tpu.matmul %41, %39, %cst_33 {dimension_numbers = #tpu.dot_dimension_numbers<[1], [0], [0], [1], [0, 0, 1, 1], [], []>} : vector<8x128xbf16>, vector<128x128xbf16>, vector<8x128xf32> -> vector<8x128xf32>
    %43 = vector.broadcast %40 : vector<1x128xf32> to vector<8x128xf32>
    %44 = arith.addf %42, %43 : vector<8x128xf32>
    %c0_34 = arith.constant 0 : index
    %c0_35 = arith.constant 0 : index
    %45 = vector.load %arg14[%c0_34, %c0_35] : memref<8x128xf32, #tpu.memory_space<vmem>>, vector<8x128xf32>
    tpu.vector_store %arg14[%c0_34, %c0_35], %44 {strides = array<i32>} : memref<8x128xf32, #tpu.memory_space<vmem>>, vector<8x128xf32>,
    return
  }
  func.func @transform_0(%arg0: i32) -> (i32, i32) {
    %c0_i32 = arith.constant 0 : i32
    %c0_i32_0 = arith.constant 0 : i32
    return %arg0, %c0_i32 : i32, i32
  }
  func.func @transform_1(%arg0: i32) -> (i32, i32) {
    %c0_i32 = arith.constant 0 : i32
    %c0_i32_0 = arith.constant 0 : i32
    %c0_i32_1 = arith.constant 0 : i32
    return %c0_i32, %c0_i32_0 : i32, i32
  }
  func.func @transform_2(%arg0: i32) -> (i32, i32) {
    %c0_i32 = arith.constant 0 : i32
    %c0_i32_0 = arith.constant 0 : i32
    %c0_i32_1 = arith.constant 0 : i32
    return %c0_i32, %c0_i32_0 : i32, i32
  }
  func.func @transform_3(%arg0: i32) -> (i32, i32) {
    %c0_i32 = arith.constant 0 : i32
    %c0_i32_0 = arith.constant 0 : i32
    %c0_i32_1 = arith.constant 0 : i32
    return %c0_i32, %c0_i32_0 : i32, i32
  }
  func.func @transform_4(%arg0: i32) -> (i32, i32) {
    %c0_i32 = arith.constant 0 : i32
    %c0_i32_0 = arith.constant 0 : i32
    %c0_i32_1 = arith.constant 0 : i32
    return %c0_i32, %c0_i32_0 : i32, i32
  }
  func.func @transform_5(%arg0: i32) -> (i32, i32) {
    %c0_i32 = arith.constant 0 : i32
    %c0_i32_0 = arith.constant 0 : i32
    %c0_i32_1 = arith.constant 0 : i32
    return %c0_i32, %c0_i32_0 : i32, i32
  }
  func.func @transform_6(%arg0: i32) -> (i32, i32) {
    %c0_i32 = arith.constant 0 : i32
    %c0_i32_0 = arith.constant 0 : i32
    %c0_i32_1 = arith.constant 0 : i32
    return %c0_i32, %c0_i32_0 : i32, i32
  }
  func.func @transform_7(%arg0: i32) -> (i32, i32) {
    %c0_i32 = arith.constant 0 : i32
    %c0_i32_0 = arith.constant 0 : i32
    %c0_i32_1 = arith.constant 0 : i32
    return %c0_i32, %c0_i32_0 : i32, i32
  }
  func.func @transform_8(%arg0: i32) -> (i32, i32) {
    %c0_i32 = arith.constant 0 : i32
    %c0_i32_0 = arith.constant 0 : i32
    %c0_i32_1 = arith.constant 0 : i32
    return %c0_i32, %c0_i32_0 : i32, i32
  }
  func.func @transform_9(%arg0: i32) -> (i32, i32) {
    %c0_i32 = arith.constant 0 : i32
    %c0_i32_0 = arith.constant 0 : i32
    %c0_i32_1 = arith.constant 0 : i32
    return %c0_i32, %c0_i32_0 : i32, i32
  }
  func.func @transform_10(%arg0: i32) -> (i32, i32) {
    %c0_i32 = arith.constant 0 : i32
    %c0_i32_0 = arith.constant 0 : i32
    %c0_i32_1 = arith.constant 0 : i32
    return %c0_i32, %c0_i32_0 : i32, i32
  }
  func.func @transform_11(%arg0: i32) -> (i32, i32) {
    %c0_i32 = arith.constant 0 : i32
    %c0_i32_0 = arith.constant 0 : i32
    %c0_i32_1 = arith.constant 0 : i32
    return %c0_i32, %c0_i32_0 : i32, i32
  }
  func.func @transform_12(%arg0: i32) -> (i32, i32) {
    %c0_i32 = arith.constant 0 : i32
    %c0_i32_0 = arith.constant 0 : i32
    %c0_i32_1 = arith.constant 0 : i32
    return %c0_i32, %c0_i32_0 : i32, i32
  }
  func.func @transform_13(%arg0: i32) -> (i32, i32) {
    %c0_i32 = arith.constant 0 : i32
    %c0_i32_0 = arith.constant 0 : i32
    return %arg0, %c0_i32 : i32, i32
  }
}

</mosaic_0001>

<bundles_post_ra>
// kernel: deep_autoencoder_forward.1
= control target key start
LH: loop header
LB: loop body
LE: loop exit
PB: predicated region body
PF: predicated region fallthrough
CT: control target
= control target key end

     0   :  { %v1005_v0 = vmov 0.0   ;;  %vm1006_vm0 = vmmov 0   ;;  %s1305_s1 = inlined_call_operand.vmem [shape: bf16[128,128], index: 1, kind: input, shape index: {}]   ;;  %s1306_s2 = inlined_call_operand.vmem [shape: bf16[128,128], index: 2, kind: input, shape index: {}]   ;;  %s1307_s0 = inlined_call_operand.vmem [shape: f32[8,128], index: 0, kind: input, shape index: {}]   ;;  %s1308_s3 = inlined_call_operand.vmem [shape: bf16[128,128], index: 3, kind: input, shape index: {}]   ;;  %s1309_s7 = inlined_call_operand.vmem [shape: f32[1,128], index: 7, kind: input, shape index: {}]   ;;  %s1310_s4 = inlined_call_operand.vmem [shape: bf16[128,128], index: 4, kind: input, shape index: {}]   ;;  %s1311_s8 = inlined_call_operand.vmem [shape: f32[1,128], index: 8, kind: input, shape index: {}]   ;;  %s1312_s5 = inlined_call_operand.vmem [shape: bf16[128,128], index: 5, kind: input, shape index: {}]   ;;  %s1313_s9 = inlined_call_operand.vmem [shape: f32[1,128], index: 9, kind: input, shape index: {}]   ;;  %s1314_s6 = inlined_call_operand.vmem [shape: bf16[128,128], index: 6, kind: input, shape index: {}]   ;;  %s1315_s10 = inlined_call_operand.vmem [shape: f32[1,128], index: 10, kind: input, shape index: {}]   ;;  %s1316_s11 = inlined_call_operand.vmem [shape: f32[1,128], index: 11, kind: input, shape index: {}]   ;;  %s1317_s12 = inlined_call_operand.vmem [shape: f32[1,128], index: 12, kind: input, shape index: {}]   ;;  %s1318_s13 = inlined_call_operand.vmem [shape: f32[8,128], index: 13, kind: output, shape index: {}]  }
   0x1   :  { %835 = vmatprep.subr.bf16.mxu0 %v1005_v0  ;;  %v957_v1 = vld [vmem:[%s1305_s1 + $0x38] sm:$0xff]   ;;  %851 = vmatprep.mubr.msk.bf16.mxu0 %vm1006_vm0, %v1005_v0  ;;  %v958_v2 = vld [vmem:[%s1305_s1 + $0x30] sm:$0xff]   ;;  %v959_v3 = vld [vmem:[%s1305_s1 + $0x28] sm:$0xff]  }
   0x2   :  { %855 = vmatprep.subr.bf16.mxu1 %v1005_v0  ;;  %871 = vmatprep.mubr.msk.bf16.mxu1 %vm1006_vm0, %v1005_v0  ;;  %v965_v4 = vld [vmem:[%s1306_s2 + $0x38] sm:$0xff]   ;;  %v960_v5 = vld [vmem:[%s1305_s1 + $0x20] sm:$0xff]   ;;  %v966_v6 = vld [vmem:[%s1306_s2 + $0x30] sm:$0xff]  }
   0x3   :  { %836 = vmatpush3.bf16.msra.mxu0 %v957_v1  ;;  %856 = vmatpush3.bf16.msra.mxu1 %v965_v4  ;;  %v961_v7 = vld [vmem:[%s1305_s1 + $0x18] sm:$0xff]   ;;  %v967_v8 = vld [vmem:[%s1306_s2 + $0x28] sm:$0xff]   ;;  %v962_v9 = vld [vmem:[%s1305_s1 + $0x10] sm:$0xff]  }
   0x4   :  { %837 = vmatprep.subr.bf16.mxu0 %v1005_v0  ;;  %857 = vmatprep.subr.bf16.mxu1 %v1005_v0  ;;  %v968_v10 = vld [vmem:[%s1306_s2 + $0x20] sm:$0xff]   ;;  %v963_v11 = vld [vmem:[%s1305_s1 + $0x8] sm:$0xff]   ;;  %v969_v12 = vld [vmem:[%s1306_s2 + $0x18] sm:$0xff]  }
   0x5   :  { %v964_v13 = vld [vmem:[%s1305_s1] sm:$0xff]   ;;  %v970_v15 = vld [vmem:[%s1306_s2 + $0x10] sm:$0xff]   ;;  %v971_v17 = vld [vmem:[%s1306_s2 + $0x8] sm:$0xff]  }
   0x6   :  { %v45_v14 = vld [vmem:[%s1307_s0] sm:$0xff]  ;;  %v973_v19 = vld [vmem:[%s1308_s3 + $0x38] sm:$0xff]   ;;  %v974_v20 = vld [vmem:[%s1308_s3 + $0x30] sm:$0xff]  }
   0x7   :  { %838 = vmatpush3.bf16.msra.mxu0 %v958_v2  ;;  %858 = vmatpush3.bf16.msra.mxu1 %v966_v6  ;;  %v63_v16 = vpack.c.bf16 %v45_v14, %v45_v14  ;;  %v972_v18 = vld [vmem:[%s1306_s2] sm:$0xff]   ;;  %v975_v21 = vld [vmem:[%s1308_s3 + $0x28] sm:$0xff]   ;;  %v977_v23 = vld [vmem:[%s1308_s3 + $0x18] sm:$0xff]  }
   0x8   :  { %839 = vmatprep.subr.bf16.mxu0 %v1005_v0  ;;  %859 = vmatprep.subr.bf16.mxu1 %v1005_v0  ;;  %v976_v22 = vld [vmem:[%s1308_s3 + $0x20] sm:$0xff]   ;;  %v978_v24 = vld [vmem:[%s1308_s3 + $0x10] sm:$0xff]   ;;  %v979_v33 = vld [vmem:[%s1308_s3 + $0x8] sm:$0xff]  }
   0x9   :  { %v727_v25 = vld [vmem:[%s1309_s7] ss:$0 sm:$0xff]  ;;  %v981_v35 = vld [vmem:[%s1310_s4 + $0x38] sm:$0xff]   ;;  %v982_v36 = vld [vmem:[%s1310_s4 + $0x30] sm:$0xff]  }
   0xa   :  { %v980_v34 = vld [vmem:[%s1308_s3] sm:$0xff]   ;;  %v983_v37 = vld [vmem:[%s1310_s4 + $0x28] sm:$0xff]   ;;  %v985_v39 = vld [vmem:[%s1310_s4 + $0x18] sm:$0xff]  }
   0xb   :  { %840 = vmatpush3.bf16.msra.mxu0 %v959_v3  ;;  %860 = vmatpush3.bf16.msra.mxu1 %v967_v8  ;;  %v984_v38 = vld [vmem:[%s1310_s4 + $0x20] sm:$0xff]   ;;  %v986_v40 = vld [vmem:[%s1310_s4 + $0x10] sm:$0xff]   ;;  %v987_v41 = vld [vmem:[%s1310_s4 + $0x8] sm:$0xff]  }
   0xc   :  { %841 = vmatprep.subr.bf16.mxu0 %v1005_v0  ;;  %861 = vmatprep.subr.bf16.mxu1 %v1005_v0  ;;  %v736_v42 = vld [vmem:[%s1311_s8] ss:$0 sm:$0xff]  ;;  %v989_v51 = vld [vmem:[%s1312_s5 + $0x38] sm:$0xff]   ;;  %v990_v52 = vld [vmem:[%s1312_s5 + $0x30] sm:$0xff]  }
   0xd   :  { %v988_v50 = vld [vmem:[%s1310_s4] sm:$0xff]   ;;  %v991_v53 = vld [vmem:[%s1312_s5 + $0x28] sm:$0xff]   ;;  %v993_v55 = vld [vmem:[%s1312_s5 + $0x18] sm:$0xff]  }
   0xe   :  { %v992_v54 = vld [vmem:[%s1312_s5 + $0x20] sm:$0xff]   ;;  %v994_v56 = vld [vmem:[%s1312_s5 + $0x10] sm:$0xff]   ;;  %v995_v1 = vld [vmem:[%s1312_s5 + $0x8] sm:$0xff]  }
   0xf   :  { %842 = vmatpush3.bf16.msra.mxu0 %v960_v5  ;;  %862 = vmatpush3.bf16.msra.mxu1 %v968_v10  ;;  %v745_v57 = vld [vmem:[%s1313_s9] ss:$0 sm:$0xff]  ;;  %v997_v3 = vld [vmem:[%s1314_s6 + $0x38] sm:$0xff]   ;;  %v998_v4 = vld [vmem:[%s1314_s6 + $0x30] sm:$0xff]  }
  0x10   :  { %843 = vmatprep.subr.bf16.mxu0 %v1005_v0  ;;  %863 = vmatprep.subr.bf16.mxu1 %v1005_v0  ;;  %v996_v2 = vld [vmem:[%s1312_s5] sm:$0xff]   ;;  %v999_v5 = vld [vmem:[%s1314_s6 + $0x28] sm:$0xff]   ;;  %v1002_v8 = vld [vmem:[%s1314_s6 + $0x10] sm:$0xff]  }
  0x11   :  { %v1000_v6 = vld [vmem:[%s1314_s6 + $0x20] sm:$0xff]  }
  0x13   :  { %844 = vmatpush3.bf16.msra.mxu0 %v961_v7  ;;  %864 = vmatpush3.bf16.msra.mxu1 %v969_v12  ;;  %v1001_v7 = vld [vmem:[%s1314_s6 + $0x18] sm:$0xff]  }
  0x14   :  { %845 = vmatprep.subr.bf16.mxu0 %v1005_v0  ;;  %865 = vmatprep.subr.bf16.mxu1 %v1005_v0 }
  0x17   :  { %846 = vmatpush3.bf16.msra.mxu0 %v962_v9  ;;  %866 = vmatpush3.bf16.msra.mxu1 %v970_v15  ;;  %v754_v9 = vld [vmem:[%s1315_s10] ss:$0 sm:$0xff] }
  0x18   :  { %847 = vmatprep.subr.bf16.mxu0 %v1005_v0  ;;  %867 = vmatprep.subr.bf16.mxu1 %v1005_v0 }
  0x1b   :  { %848 = vmatpush3.bf16.msra.mxu0 %v963_v11  ;;  %868 = vmatpush3.bf16.msra.mxu1 %v971_v17  ;;  %v1003_v17 = vld [vmem:[%s1314_s6 + $0x8] sm:$0xff]  }
  0x1c   :  { %849 = vmatprep.subr.bf16.mxu0 %v1005_v0  ;;  %869 = vmatprep.subr.bf16.mxu1 %v1005_v0 }
  0x1f   :  { %850 = vmatpush3.bf16.msra.mxu0 %v964_v13  ;;  %870 = vmatpush3.bf16.msra.mxu1 %v972_v18  ;;  %v1004_v18 = vld [vmem:[%s1314_s6] sm:$0xff]  }
  0x20   :  { %875 = vmatprep.subr.bf16.mxu0 %v1005_v0  ;;  %895 = vmatprep.subr.bf16.mxu1 %v1005_v0 }
  0x22   :  { %852 = vmatmul.mubr.bf16.vlgmr.msra.gmra.mxu0 %v63_v16 }
  0x23   :  { %891 = vmatprep.mubr.msk.bf16.mxu0 %vm1006_vm0, %v1005_v0  ;;  %876 = vmatpush3.bf16.msra.mxu0 %v973_v19  ;;  %v763_v19 = vld [vmem:[%s1316_s11] ss:$0 sm:$0xff] }
  0x24   :  { %877 = vmatprep.subr.bf16.mxu0 %v1005_v0 }
  0x27   :  { %878 = vmatpush3.bf16.msra.mxu0 %v974_v20 }
  0x28   :  { %879 = vmatprep.subr.bf16.mxu0 %v1005_v0 }
  0x2b   :  { %880 = vmatpush3.bf16.msra.mxu0 %v975_v21 }
  0x2c   :  { %881 = vmatprep.subr.bf16.mxu0 %v1005_v0 }
  0x2f   :  { %882 = vmatpush3.bf16.msra.mxu0 %v976_v22 }
  0x30   :  { %883 = vmatprep.subr.bf16.mxu0 %v1005_v0 }
  0x33   :  { %884 = vmatpush3.bf16.msra.mxu0 %v977_v23 }
  0x34   :  { %885 = vmatprep.subr.bf16.mxu0 %v1005_v0 }
  0x37   :  { %886 = vmatpush3.bf16.msra.mxu0 %v978_v24 }
  0x38   :  { %887 = vmatprep.subr.bf16.mxu0 %v1005_v0 }
  0x3b   :  { %888 = vmatpush3.bf16.msra.mxu0 %v979_v33 }
  0x3c   :  { %889 = vmatprep.subr.bf16.mxu0 %v1005_v0 }
  0x3f   :  { %890 = vmatpush3.bf16.msra.mxu0 %v980_v34 }
  0x40   :  { %915 = vmatprep.subr.bf16.mxu0 %v1005_v0 }
  0xe2   :  { %v152_v26 = vpop.f32.mrf.mxu0 }
  0xe3   :  { %v153_v27 = vadd.f32 %v727_v25, %v152_v26 }
  0xe4   :  { %v853_v28 = vpop.f32.mrf.mxu0 }
  0xe5   :  { %v158_v29 = vmax.f32 %v153_v27, 0.0 }
  0xe6   :  { %v155_v30 = vpop.f32.mrf.mxu0 }
  0xe7   :  { %v176_v31 = vpack.c.bf16 %v158_v29, %v158_v29 }
  0xe8   :  { %v854_v32 = vpop.f32.mrf.mxu0 }
  0xe9   :  { %872 = vmatmul.mubr.bf16.vlgmr.msra.gmra.mxu1 %v176_v31 }
  0xea   :  { %911 = vmatprep.mubr.msk.bf16.mxu1 %vm1006_vm0, %v1005_v0  ;;  %896 = vmatpush3.bf16.msra.mxu1 %v981_v35 }
  0xeb   :  { %897 = vmatprep.subr.bf16.mxu1 %v1005_v0 }
  0xee   :  { %898 = vmatpush3.bf16.msra.mxu1 %v982_v36 }
  0xef   :  { %899 = vmatprep.subr.bf16.mxu1 %v1005_v0 }
  0xf2   :  { %900 = vmatpush3.bf16.msra.mxu1 %v983_v37 }
  0xf3   :  { %901 = vmatprep.subr.bf16.mxu1 %v1005_v0 }
  0xf6   :  { %902 = vmatpush3.bf16.msra.mxu1 %v984_v38 }
  0xf7   :  { %903 = vmatprep.subr.bf16.mxu1 %v1005_v0 }
  0xfa   :  { %904 = vmatpush3.bf16.msra.mxu1 %v985_v39 }
  0xfb   :  { %905 = vmatprep.subr.bf16.mxu1 %v1005_v0 }
  0xfe   :  { %906 = vmatpush3.bf16.msra.mxu1 %v986_v40 }
  0xff   :  { %907 = vmatprep.subr.bf16.mxu1 %v1005_v0 }
 0x102   :  { %908 = vmatpush3.bf16.msra.mxu1 %v987_v41 }
 0x103   :  { %909 = vmatprep.subr.bf16.mxu1 %v1005_v0 }
 0x106   :  { %910 = vmatpush3.bf16.msra.mxu1 %v988_v50 }
 0x107   :  { %935 = vmatprep.subr.bf16.mxu1 %v1005_v0 }
 0x1a9   :  { %v265_v43 = vpop.f32.mrf.mxu1 }
 0x1aa   :  { %v266_v44 = vadd.f32 %v736_v42, %v265_v43 }
 0x1ab   :  { %v873_v45 = vpop.f32.mrf.mxu1 }
 0x1ac   :  { %v271_v46 = vmax.f32 %v266_v44, 0.0 }
 0x1ad   :  { %v268_v47 = vpop.f32.mrf.mxu1 }
 0x1ae   :  { %v289_v48 = vpack.c.bf16 %v271_v46, %v271_v46 }
 0x1af   :  { %v874_v49 = vpop.f32.mrf.mxu1 }
 0x1b0   :  { %892 = vmatmul.mubr.bf16.vlgmr.msra.gmra.mxu0 %v289_v48 }
 0x1b1   :  { %931 = vmatprep.mubr.msk.bf16.mxu0 %vm1006_vm0, %v1005_v0  ;;  %916 = vmatpush3.bf16.msra.mxu0 %v989_v51 }
 0x1b2   :  { %917 = vmatprep.subr.bf16.mxu0 %v1005_v0 }
 0x1b5   :  { %918 = vmatpush3.bf16.msra.mxu0 %v990_v52 }
 0x1b6   :  { %919 = vmatprep.subr.bf16.mxu0 %v1005_v0 }
 0x1b9   :  { %920 = vmatpush3.bf16.msra.mxu0 %v991_v53 }
 0x1ba   :  { %921 = vmatprep.subr.bf16.mxu0 %v1005_v0 }
 0x1bd   :  { %922 = vmatpush3.bf16.msra.mxu0 %v992_v54 }
 0x1be   :  { %923 = vmatprep.subr.bf16.mxu0 %v1005_v0 }
 0x1c1   :  { %924 = vmatpush3.bf16.msra.mxu0 %v993_v55 }
 0x1c2   :  { %925 = vmatprep.subr.bf16.mxu0 %v1005_v0 }
 0x1c5   :  { %926 = vmatpush3.bf16.msra.mxu0 %v994_v56 }
 0x1c6   :  { %927 = vmatprep.subr.bf16.mxu0 %v1005_v0 }
 0x1c9   :  { %928 = vmatpush3.bf16.msra.mxu0 %v995_v1 }
 0x1ca   :  { %929 = vmatprep.subr.bf16.mxu0 %v1005_v0 }
 0x1cd   :  { %930 = vmatpush3.bf16.msra.mxu0 %v996_v2 }
 0x270   :  { %v378_v58 = vpop.f32.mrf.mxu0 }
 0x271   :  { %v379_v59 = vadd.f32 %v745_v57, %v378_v58 }
 0x272   :  { %v893_v60 = vpop.f32.mrf.mxu0 }
 0x273   :  { %v401_v61 = vpack.c.bf16 %v379_v59, %v379_v59 }
 0x274   :  { %v381_v62 = vpop.f32.mrf.mxu0 }
 0x275   :  { %912 = vmatmul.mubr.bf16.vlgmr.msra.gmra.mxu1 %v401_v61 }
 0x276   :  { %v894_v63 = vpop.f32.mrf.mxu0  ;;  %951 = vmatprep.mubr.msk.bf16.mxu1 %vm1006_vm0, %v1005_v0  ;;  %936 = vmatpush3.bf16.msra.mxu1 %v997_v3 }
 0x277   :  { %937 = vmatprep.subr.bf16.mxu1 %v1005_v0 }
 0x27a   :  { %938 = vmatpush3.bf16.msra.mxu1 %v998_v4 }
 0x27b   :  { %939 = vmatprep.subr.bf16.mxu1 %v1005_v0 }
 0x27e   :  { %940 = vmatpush3.bf16.msra.mxu1 %v999_v5 }
 0x27f   :  { %941 = vmatprep.subr.bf16.mxu1 %v1005_v0 }
 0x282   :  { %942 = vmatpush3.bf16.msra.mxu1 %v1000_v6 }
 0x283   :  { %943 = vmatprep.subr.bf16.mxu1 %v1005_v0 }
 0x286   :  { %944 = vmatpush3.bf16.msra.mxu1 %v1001_v7 }
 0x287   :  { %945 = vmatprep.subr.bf16.mxu1 %v1005_v0 }
 0x28a   :  { %946 = vmatpush3.bf16.msra.mxu1 %v1002_v8 }
 0x28b   :  { %947 = vmatprep.subr.bf16.mxu1 %v1005_v0 }
 0x28e   :  { %948 = vmatpush3.bf16.msra.mxu1 %v1003_v17 }
 0x28f   :  { %949 = vmatprep.subr.bf16.mxu1 %v1005_v0  ;;  %v772_v0 = vld [vmem:[%s1317_s12] ss:$0 sm:$0xff] }
 0x292   :  { %950 = vmatpush3.bf16.msra.mxu1 %v1004_v18 }
 0x335   :  { %v490_v10 = vpop.f32.mrf.mxu1 }
 0x336   :  { %v491_v11 = vadd.f32 %v754_v9, %v490_v10 }
 0x337   :  { %v913_v12 = vpop.f32.mrf.mxu1 }
 0x338   :  { %v496_v13 = vmax.f32 %v491_v11, 0.0 }
 0x339   :  { %v493_v14 = vpop.f32.mrf.mxu1 }
 0x33a   :  { %v514_v15 = vpack.c.bf16 %v496_v13, %v496_v13 }
 0x33b   :  { %v914_v16 = vpop.f32.mrf.mxu1 }
 0x33c   :  { %932 = vmatmul.mubr.bf16.vlgmr.msra.gmra.mxu0 %v514_v15 }
 0x3fc   :  { %v603_v20 = vpop.f32.mrf.mxu0 }
 0x3fd   :  { %v604_v21 = vadd.f32 %v763_v19, %v603_v20 }
 0x3fe   :  { %v933_v22 = vpop.f32.mrf.mxu0 }
 0x3ff   :  { %v609_v23 = vmax.f32 %v604_v21, 0.0 }
 0x400   :  { %v606_v24 = vpop.f32.mrf.mxu0 }
 0x401   :  { %v627_v25 = vpack.c.bf16 %v609_v23, %v609_v23 }
 0x402   :  { %v934_v26 = vpop.f32.mrf.mxu0 }
 0x403   :  { %952 = vmatmul.mubr.bf16.vlgmr.msra.gmra.mxu1 %v627_v25 }
 0x4c3   :  { %v716_v27 = vpop.f32.mrf.mxu1 }
 0x4c4   :  { %v717_v28 = vadd.f32 %v772_v0, %v716_v27 }
 0x4c5   :  { %v953_v29 = vpop.f32.mrf.mxu1 }
 0x4c6   :  { %722 = vst [vmem:[%s1318_s13] sm:$0xff] %v717_v28 }
 0x4c7   :  { %v719_v30 = vpop.f32.mrf.mxu1 }
 0x4c9   :  { %v954_v31 = vpop.f32.mrf.mxu1 }

</bundles_post_ra>
